<compile_context>
chip_gen: v5e
topology: v5e:2x2
jax: 0.10.0
libtpu: 0.0.40
codegen_flags: <defaults>
</compile_context>

<pallas_src>
import jax
import jax.numpy as jnp
import numpy as np
from jax.experimental import pallas as pl
from jax.experimental.pallas import tpu as pltpu

TRACK_FEAT_DIM = 8     # per-frame track feature dim (last col dropped in forward)
TRACK_OUT = 64         # TrackEncoder output size == temporal encoder size
DEC_OUT = 16           # DecoderHeads hidden size
N_PTS = 16             # points per frame for the (unused) point cloud input


def _round_up(x, m):
    return (x + m - 1) // m * m


# --------------------------------------------------------------------------
# Kernel
# --------------------------------------------------------------------------
def _track_net_kernel(tracks_ref, wenc_ref, w2_ref, bias_pe_ref, b2_ref, out_ref):
    tb, wp, f = tracks_ref.shape          # static block shape
    m = tb * wp
    rows = out_ref.shape[1]               # m + tbp (tbp = tb rounded up to 8)
    tbp = rows - m
    hid = wenc_ref.shape[1]               # 64 (== TrackEncoder out == 4*DEC_OUT)

    x = tracks_ref[...].reshape(m, f)                          # (M, 8) f32
    # padding_mask = (sum(tracks, -1) == 0)
    pad = jnp.sum(x, axis=-1, keepdims=True) == 0.0            # (M, 1)

    # Packed weights / biases (static slices of the slabs).
    te_w2 = wenc_ref[0:hid, :]                                 # (64, 64) bf16
    hd_w1 = wenc_ref[hid:2 * hid, :]                           # (64, 64) bf16 (fused heads L1)
    te_w1 = wenc_ref[2 * hid:2 * hid + f, :]                   # (8, 64) bf16 (row 7 is zero)
    te_b1 = bias_pe_ref[0:1, :]                                # (1, 64) f32
    te_b2 = bias_pe_ref[1:2, :]
    hd_b1 = bias_pe_ref[2:3, :]
    pe = bias_pe_ref[8:8 + m, :]                               # (M, 64) f32 (tiled per batch elem)

    # TrackEncoder on tracks[:, :, :-1] (te_w1 row for feature 7 is zero).
    # TODO(synk): TrackEncoder definition not provided in the reference file;
    # using Linear->ReLU->Linear (dropout=0) that zeroes padded frames.
    xb = x.astype(jnp.bfloat16)
    h = jnp.maximum(
        jnp.dot(xb, te_w1, preferred_element_type=jnp.float32) + te_b1, 0.0)
    h = jnp.dot(h.astype(jnp.bfloat16), te_w2,
                preferred_element_type=jnp.float32) + te_b2

    # SinusoidalPositionalEncoding (additive), single fused select for padding.
    # TODO(synk): SinusoidalPositionalEncoding definition not provided; standard sin/cos table.
    h = jnp.where(pad, 0.0, h + pe)                            # (M, 64) f32

    # Temporal encoder ('pool' variant).
    # TODO(synk): PoolTempEnc definition not provided; identity per-frame pass-through.

    # Size-head pool: per-batch-element max over the window (XLU reduce).
    pooled = jnp.max(h.reshape(tb, wp, hid), axis=1)           # (TB, 64)
    if tbp > tb:
        pooled = jnp.concatenate(
            [pooled, jnp.zeros((tbp - tb, hid), jnp.float32)], axis=0)

    # Fused DecoderHeads: per-frame rows + pooled rows through the same 2 matmuls.
    h_aug = jnp.concatenate([h, pooled], axis=0)               # (rows, 64)
    hh = jnp.maximum(
        jnp.dot(h_aug.astype(jnp.bfloat16), hd_w1,
                preferred_element_type=jnp.float32) + hd_b1, 0.0)
    out = jnp.dot(hh.astype(jnp.bfloat16), w2_ref[...],
                  preferred_element_type=jnp.float32) + b2_ref[...]   # (rows, 128)

    # Lanes: 0:3 center, 3:6 size (valid only on pooled rows), 6 rot, 7 score logit.
    lane = jax.lax.broadcasted_iota(jnp.int32, out.shape, 1)
    out_ref[0] = jnp.where(lane == 7, jax.nn.sigmoid(out), out)


# --------------------------------------------------------------------------
# Parameters / packing
# --------------------------------------------------------------------------
def _sinusoidal_pe(max_len, d_model):
    pos = jnp.arange(max_len, dtype=jnp.float32)[:, None]
    i = jnp.arange(0, d_model, 2, dtype=jnp.float32)[None, :]
    div = jnp.exp(-(jnp.log(10000.0)) * i / d_model)
    pe = jnp.zeros((max_len, d_model), dtype=jnp.float32)
    pe = pe.at[:, 0::2].set(jnp.sin(pos * div))
    pe = pe.at[:, 1::2].set(jnp.cos(pos * div))
    return pe


def init_params(key, window_size):
    """Deterministic synthetic parameters (shapes follow TrackNet.__init__)."""
    ks = jax.random.split(key, 24)
    scale = 0.1

    def lin(kw, kb, fan_in, fan_out):
        w = scale * jax.random.normal(kw, (fan_in, fan_out), jnp.float32)
        b = scale * jax.random.normal(kb, (1, fan_out), jnp.float32)
        return w, b

    p = {}
    # TrackEncoder: input_dim = track_feat_dim - 1 = 7, out_size = 64
    w1, p["te_b1"] = lin(ks[0], ks[1], TRACK_FEAT_DIM - 1, TRACK_OUT)
    # zero-pad contracting dim 7 -> 8 so the kernel can consume full track rows
    p["te_w1"] = jnp.concatenate([w1, jnp.zeros((1, TRACK_OUT), jnp.float32)], axis=0)
    p["te_w2"], p["te_b2"] = lin(ks[2], ks[3], TRACK_OUT, TRACK_OUT)

    # DecoderHeads(in_size=64, out_size=16)
    p["c_w1"], p["c_b1"] = lin(ks[4], ks[5], TRACK_OUT, DEC_OUT)
    p["c_w2"], p["c_b2"] = lin(ks[6], ks[7], DEC_OUT, 3)
    p["s_w1"], p["s_b1"] = lin(ks[8], ks[9], TRACK_OUT, DEC_OUT)
    p["s_w2"], p["s_b2"] = lin(ks[10], ks[11], DEC_OUT, 3)
    p["r_w1"], p["r_b1"] = lin(ks[12], ks[13], TRACK_OUT, DEC_OUT)
    p["r_w2"], p["r_b2"] = lin(ks[14], ks[15], DEC_OUT, 1)
    p["g_w1"], p["g_b1"] = lin(ks[16], ks[17], TRACK_OUT, DEC_OUT)
    p["g_w2"], p["g_b2"] = lin(ks[18], ks[19], DEC_OUT, 1)

    p["pos_enc"] = _sinusoidal_pe(window_size, TRACK_OUT)
    return p


def _pack_weights(p, tb, wp, w):
    """Pack the 20 parameter tensors into 4 kernel slabs (layout plumbing only)."""
    f32 = jnp.float32
    do = p["c_w2"].shape[0]                       # decoder hidden (16)
    hid = p["te_w2"].shape[0]                     # 64

    # Fused heads layer 1: [center | size | rot | gt]  -> (64, 4*do)
    hd_w1 = jnp.concatenate([p["c_w1"], p["s_w1"], p["r_w1"], p["g_w1"]], axis=1)
    hd_b1 = jnp.concatenate([p["c_b1"], p["s_b1"], p["r_b1"], p["g_b1"]], axis=1)

    # Block-diagonal layer 2 -> 8 output lanes: [center(3) size(3) rot(1) score(1)]
    hd_w2 = jnp.zeros((4 * do, 8), f32)
    hd_w2 = hd_w2.at[0 * do:1 * do, 0:3].set(p["c_w2"])
    hd_w2 = hd_w2.at[1 * do:2 * do, 3:6].set(p["s_w2"])
    hd_w2 = hd_w2.at[2 * do:3 * do, 6:7].set(p["r_w2"])
    hd_w2 = hd_w2.at[3 * do:4 * do, 7:8].set(p["g_w2"])
    hd_b2 = jnp.concatenate([p["c_b2"], p["s_b2"], p["r_b2"], p["g_b2"]], axis=1)

    # Pad layer-2 output lanes to 128 for an unmasked, lane-dense output store.
    w2_128 = jnp.pad(hd_w2, ((0, 0), (0, 128 - hd_w2.shape[1]))).astype(jnp.bfloat16)
    b2_128 = jnp.pad(hd_b2, ((0, 0), (0, 128 - hd_b2.shape[1])))

    # bf16 matrix slab: rows [0:64]=te_w2, [64:128]=fused head W1, [128:136]=te_w1.
    wenc = jnp.concatenate([p["te_w2"], hd_w1, p["te_w1"]], axis=0).astype(jnp.bfloat16)

    # f32 bias + positional-encoding slab: rows 0..2 biases, rows 8.. = PE tiled TB times.
    pe = p["pos_enc"][:w]
    pe = jnp.pad(pe, ((0, wp - w), (0, 0)))
    bias_pe = jnp.concatenate(
        [p["te_b1"], p["te_b2"], hd_b1, jnp.zeros((5, hid), f32), jnp.tile(pe, (tb, 1))],
        axis=0)
    return wenc, w2_128, bias_pe, b2_128


# --------------------------------------------------------------------------
# Wrapper
# --------------------------------------------------------------------------
@jax.jit
def track_net_forward(tracks, pcs, params):
    """tracks: (B, W, 8) f32, pcs: (B, W, N, 4) f32 (unused, as in the torch forward)."""
    del pcs  # unused by the reference forward
    B, W, F = tracks.shape

    # Sublane-align the window and pick a batch block so M = TB*Wp is MXU-sized,
    # while keeping >= 2 grid programs when possible (v7x megacore).
    wp = _round_up(W, 8)
    tb = max(1, min(B, pl.cdiv(256, wp)))
    grid = pl.cdiv(B, tb)
    if B >= 2 and grid < 2:
        tb = pl.cdiv(B, 2)
        grid = pl.cdiv(B, tb)
    bp = grid * tb
    tbp = _round_up(tb, 8)
    m = tb * wp
    rows = m + tbp

    tr = tracks
    if wp != W or bp != B:
        tr = jnp.pad(tracks, ((0, bp - B), (0, wp - W), (0, 0)))   # zero frames => padded

    wenc, w2, bias_pe, b2 = _pack_weights(params, tb, wp, W)

    in_specs = [
        pl.BlockSpec((tb, wp, F), lambda b: (b, 0, 0)),
        pl.BlockSpec(wenc.shape, lambda b: (0, 0)),
        pl.BlockSpec(w2.shape, lambda b: (0, 0)),
        pl.BlockSpec(bias_pe.shape, lambda b: (0, 0)),
        pl.BlockSpec(b2.shape, lambda b: (0, 0)),
    ]
    out_specs = pl.BlockSpec((1, rows, 128), lambda b: (b, 0, 0))
    out_shape = jax.ShapeDtypeStruct((grid, rows, 128), jnp.float32)

    out_slab = pl.pallas_call(
        _track_net_kernel,
        out_shape=out_shape,
        grid_spec=pltpu.PrefetchScalarGridSpec(
            num_scalar_prefetch=0,
            grid=(grid,),
            in_specs=in_specs,
            out_specs=out_specs,
        ),
        compiler_params=pltpu.CompilerParams(
            dimension_semantics=("parallel",)),
    )(tr, wenc, w2, bias_pe, b2)

    per_frame = out_slab[:, :m, :].reshape(grid * tb, wp, 128)[:B, :W]
    center = per_frame[..., 0:3]
    rot = per_frame[..., 6:7]
    score = per_frame[..., 7:8]
    size = out_slab[:, m:m + tb, 3:6].reshape(grid * tb, 3)[:B]
    return center, size, rot, score


# --------------------------------------------------------------------------
# Pure-JAX reference (same module assumptions), for a correctness check
# --------------------------------------------------------------------------
def _reference_forward(tracks, params):
    B, W, F = tracks.shape
    pad = (jnp.sum(tracks, axis=-1) == 0.0)[..., None]            # (B, W, 1)
    te_w1 = params["te_w1"][:F - 1]
    h = jnp.maximum(tracks[..., :F - 1] @ te_w1 + params["te_b1"], 0.0)
    h = h @ params["te_w2"] + params["te_b2"]
    h = jnp.where(pad, 0.0, h)
    pe = params["pos_enc"][:W][None]
    h = h + jnp.where(pad, 0.0, pe)
    # 'pool' temporal encoder treated as identity (same assumption as the kernel)

    def head(w1, b1, w2, b2, x):
        return jnp.maximum(x @ w1 + b1, 0.0) @ w2 + b2

    center = head(params["c_w1"], params["c_b1"], params["c_w2"], params["c_b2"], h)
    rot = head(params["r_w1"], params["r_b1"], params["r_w2"], params["r_b2"], h)
    score = jax.nn.sigmoid(
        head(params["g_w1"], params["g_b1"], params["g_w2"], params["g_b2"], h))
    pooled = jnp.max(h, axis=1)
    size = head(params["s_w1"], params["s_b1"], params["s_w2"], params["s_b2"], pooled)
    return center, size, rot, score


if __name__ == "__main__":
    key = jax.random.PRNGKey(0)
    k_tracks, k_pcs, k_params = jax.random.split(key, 3)

    B_SIZE, W_SIZE = 4, 16
    tracks = jax.random.normal(k_tracks, (B_SIZE, W_SIZE, TRACK_FEAT_DIM), jnp.float32)
    # simulate padded (all-zero) frames
    tracks = tracks.at[0, -3:, :].set(0.0)
    tracks = tracks.at[2, :2, :].set(0.0)
    pcs = jax.random.normal(k_pcs, (B_SIZE, W_SIZE, N_PTS, 4), jnp.float32)

    params = init_params(k_params, window_size=W_SIZE)

    center, size, rot, score = track_net_forward(tracks, pcs, params)
    jax.block_until_ready((center, size, rot, score))

    assert center.shape == (B_SIZE, W_SIZE, 3)
    assert size.shape == (B_SIZE, 3)
    assert rot.shape == (B_SIZE, W_SIZE, 1)
    assert score.shape == (B_SIZE, W_SIZE, 1)
    assert bool(jnp.all((score >= 0.0) & (score <= 1.0)))

    # Compare against the f32 pure-JAX reference (kernel matmuls are bf16 -> loose tol).
    c_ref, s_ref, r_ref, g_ref = _reference_forward(tracks, params)
    np.testing.assert_allclose(np.asarray(center), np.asarray(c_ref), rtol=5e-2, atol=5e-2)
    np.testing.assert_allclose(np.asarray(size), np.asarray(s_ref), rtol=5e-2, atol=5e-2)
    np.testing.assert_allclose(np.asarray(rot), np.asarray(r_ref), rtol=5e-2, atol=5e-2)
    np.testing.assert_allclose(np.asarray(score), np.asarray(g_ref), rtol=5e-2, atol=5e-2)

    print("KERNEL_OK")
</pallas_src>

<mosaic_0001>
module attributes {stable_mosaic.version = 11 : i64} {
  func.func @_track_net_kernel(%arg0: i32, %arg1: memref<2x16x8xf32, #tpu.memory_space<vmem>>, %arg2: memref<136x64xbf16, #tpu.memory_space<vmem>>, %arg3: memref<64x128xbf16, #tpu.memory_space<vmem>>, %arg4: memref<40x64xf32, #tpu.memory_space<vmem>>, %arg5: memref<1x128xf32, #tpu.memory_space<vmem>>, %arg6: memref<1x40x128xf32, #tpu.memory_space<vmem>>) attributes {dimension_semantics = [#tpu.dimension_semantics<parallel>], iteration_bounds = array<i64: 2>, scalar_prefetch = 0 : i64, scratch_operands = 0 : i64, tpu.core_type = #tpu.core_type<tc>, window_params = [{transform_indices = @transform_0, window_bounds = array<i64: 2, 16, 8>}, {pipeline_mode = #tpu.pipeline_mode<synchronous>, transform_indices = @transform_1, window_bounds = array<i64: 136, 64>}, {pipeline_mode = #tpu.pipeline_mode<synchronous>, transform_indices = @transform_2, window_bounds = array<i64: 64, 128>}, {pipeline_mode = #tpu.pipeline_mode<synchronous>, transform_indices = @transform_3, window_bounds = array<i64: 40, 64>}, {pipeline_mode = #tpu.pipeline_mode<synchronous>, transform_indices = @transform_4, window_bounds = array<i64: 1, 128>}, {transform_indices = @transform_5, window_bounds = array<i64: 1, 40, 128>}]} {
    %c0 = arith.constant 0 : index
    %c0_0 = arith.constant 0 : index
    %c0_1 = arith.constant 0 : index
    %0 = vector.load %arg1[%c0, %c0_0, %c0_1] : memref<2x16x8xf32, #tpu.memory_space<vmem>>, vector<2x16x8xf32>
    %1 = vector.shape_cast %0 : vector<2x16x8xf32> to vector<32x8xf32>
    %cst = arith.constant dense<0.000000e+00> : vector<32xf32>
    %2 = vector.multi_reduction <add>, %1, %cst [1] : vector<32x8xf32> to vector<32xf32>
    %3 = vector.shape_cast %2 : vector<32xf32> to vector<32x1xf32>
    %cst_2 = arith.constant 0.000000e+00 : f32
    %4 = vector.broadcast %cst_2 : f32 to vector<32x1xf32>
    %5 = arith.cmpf oeq, %3, %4 : vector<32x1xf32>
    %c0_3 = arith.constant 0 : index
    %c0_4 = arith.constant 0 : index
    %6 = vector.load %arg2[%c0_3, %c0_4] : memref<136x64xbf16, #tpu.memory_space<vmem>>, vector<64x64xbf16>
    %c64 = arith.constant 64 : index
    %c0_5 = arith.constant 0 : index
    %7 = vector.load %arg2[%c64, %c0_5] : memref<136x64xbf16, #tpu.memory_space<vmem>>, vector<64x64xbf16>
    %c128 = arith.constant 128 : index
    %c0_6 = arith.constant 0 : index
    %8 = vector.load %arg2[%c128, %c0_6] : memref<136x64xbf16, #tpu.memory_space<vmem>>, vector<8x64xbf16>
    %c0_7 = arith.constant 0 : index
    %c0_8 = arith.constant 0 : index
    %9 = vector.load %arg4[%c0_7, %c0_8] : memref<40x64xf32, #tpu.memory_space<vmem>>, vector<1x64xf32>
    %c1 = arith.constant 1 : index
    %c0_9 = arith.constant 0 : index
    %10 = vector.load %arg4[%c1, %c0_9] : memref<40x64xf32, #tpu.memory_space<vmem>>, vector<1x64xf32>
    %c2 = arith.constant 2 : index
    %c0_10 = arith.constant 0 : index
    %11 = vector.load %arg4[%c2, %c0_10] : memref<40x64xf32, #tpu.memory_space<vmem>>, vector<1x64xf32>
    %c8 = arith.constant 8 : index
    %c0_11 = arith.constant 0 : index
    %12 = vector.load %arg4[%c8, %c0_11] : memref<40x64xf32, #tpu.memory_space<vmem>>, vector<32x64xf32>
    %13 = arith.truncf %1 : vector<32x8xf32> to vector<32x8xbf16>
    %cst_12 = arith.constant dense<0.000000e+00> : vector<32x64xf32>
    %14 = tpu.matmul %13, %8, %cst_12 {dimension_numbers = #tpu.dot_dimension_numbers<[1], [0], [0], [1], [0, 0, 1, 1], [], []>} : vector<32x8xbf16>, vector<8x64xbf16>, vector<32x64xf32> -> vector<32x64xf32>
    %15 = vector.broadcast %9 : vector<1x64xf32> to vector<32x64xf32>
    %16 = arith.addf %14, %15 : vector<32x64xf32>
    %cst_13 = arith.constant 0.000000e+00 : f32
    %17 = vector.broadcast %cst_13 : f32 to vector<32x64xf32>
    %18 = arith.maximumf %16, %17 : vector<32x64xf32>
    %19 = arith.truncf %18 : vector<32x64xf32> to vector<32x64xbf16>
    %cst_14 = arith.constant dense<0.000000e+00> : vector<32x64xf32>
    %20 = tpu.matmul %19, %6, %cst_14 {dimension_numbers = #tpu.dot_dimension_numbers<[1], [0], [0], [1], [0, 0, 1, 1], [], []>} : vector<32x64xbf16>, vector<64x64xbf16>, vector<32x64xf32> -> vector<32x64xf32>
    %21 = vector.broadcast %10 : vector<1x64xf32> to vector<32x64xf32>
    %22 = arith.addf %20, %21 : vector<32x64xf32>
    %23 = arith.addf %22, %12 : vector<32x64xf32>
    %cst_15 = arith.constant 0.000000e+00 : f32
    %24 = vector.shape_cast %5 : vector<32x1xi1> to vector<32x1xi1>
    %25 = vector.broadcast %24 : vector<32x1xi1> to vector<32x64xi1>
    %26 = vector.broadcast %cst_15 : f32 to vector<32x64xf32>
    %27 = arith.select %25, %26, %23 : vector<32x64xi1>, vector<32x64xf32>
    %28 = vector.shape_cast %27 : vector<32x64xf32> to vector<2x16x64xf32>
    %cst_16 = arith.constant dense<0xFF800000> : vector<2x64xf32>
    %29 = vector.multi_reduction <maximumf>, %28, %cst_16 [1] : vector<2x16x64xf32> to vector<2x64xf32>
    %cst_17 = arith.constant 0.000000e+00 : f32
    %30 = vector.broadcast %cst_17 : f32 to vector<6x64xf32>
    %31 = tpu.concatenate %29, %30 in 0 : vector<2x64xf32>, vector<6x64xf32> -> vector<8x64xf32>
    %32 = tpu.concatenate %27, %31 in 0 : vector<32x64xf32>, vector<8x64xf32> -> vector<40x64xf32>
    %33 = arith.truncf %32 : vector<40x64xf32> to vector<40x64xbf16>
    %cst_18 = arith.constant dense<0.000000e+00> : vector<40x64xf32>
    %34 = tpu.matmul %33, %7, %cst_18 {dimension_numbers = #tpu.dot_dimension_numbers<[1], [0], [0], [1], [0, 0, 1, 1], [], []>} : vector<40x64xbf16>, vector<64x64xbf16>, vector<40x64xf32> -> vector<40x64xf32>
    %35 = vector.broadcast %11 : vector<1x64xf32> to vector<40x64xf32>
    %36 = arith.addf %34, %35 : vector<40x64xf32>
    %cst_19 = arith.constant 0.000000e+00 : f32
    %37 = vector.broadcast %cst_19 : f32 to vector<40x64xf32>
    %38 = arith.maximumf %36, %37 : vector<40x64xf32>
    %39 = arith.truncf %38 : vector<40x64xf32> to vector<40x64xbf16>
    %c0_20 = arith.constant 0 : index
    %c0_21 = arith.constant 0 : index
    %40 = vector.load %arg3[%c0_20, %c0_21] : memref<64x128xbf16, #tpu.memory_space<vmem>>, vector<64x128xbf16>
    %cst_22 = arith.constant dense<0.000000e+00> : vector<40x128xf32>
    %41 = tpu.matmul %39, %40, %cst_22 {dimension_numbers = #tpu.dot_dimension_numbers<[1], [0], [0], [1], [0, 0, 1, 1], [], []>} : vector<40x64xbf16>, vector<64x128xbf16>, vector<40x128xf32> -> vector<40x128xf32>
    %c0_23 = arith.constant 0 : index
    %c0_24 = arith.constant 0 : index
    %42 = vector.load %arg5[%c0_23, %c0_24] : memref<1x128xf32, #tpu.memory_space<vmem>>, vector<1x128xf32>
    %43 = vector.broadcast %42 : vector<1x128xf32> to vector<40x128xf32>
    %44 = arith.addf %41, %43 : vector<40x128xf32>
    %45 = tpu.iota {dimensions = array<i32: 1>} : vector<40x128xi32>
    %c7_i32 = arith.constant 7 : i32
    %46 = vector.broadcast %c7_i32 : i32 to vector<40x128xi32>
    %47 = arith.cmpi eq, %45, %46 : vector<40x128xi32>
    %48 = arith.negf %44 : vector<40x128xf32>
    %49 = math.exp %48 : vector<40x128xf32>
    %cst_25 = arith.constant 1.000000e+00 : f32
    %50 = vector.broadcast %cst_25 : f32 to vector<40x128xf32>
    %51 = arith.addf %50, %49 : vector<40x128xf32>
    %52 = arith.divf %50, %51 : vector<40x128xf32>
    %53 = arith.select %47, %52, %44 : vector<40x128xi1>, vector<40x128xf32>
    %c0_26 = arith.constant 0 : index
    %c0_27 = arith.constant 0 : index
    %c0_28 = arith.constant 0 : index
    %54 = vector.load %arg6[%c0_26, %c0_27, %c0_28] : memref<1x40x128xf32, #tpu.memory_space<vmem>>, vector<1x40x128xf32>
    %55 = vector.shape_cast %54 : vector<1x40x128xf32> to vector<40x128xf32>
    %56 = vector.shape_cast %53 : vector<40x128xf32> to vector<1x40x128xf32>
    tpu.vector_store %arg6[%c0_26, %c0_27, %c0_28], %56 {strides = array<i32>} : memref<1x40x128xf32, #tpu.memory_space<vmem>>, vector<1x40x128xf32>,
    return
  }
  func.func @transform_0(%arg0: i32) -> (i32, i32, i32) {
    %c0_i32 = arith.constant 0 : i32
    %c0_i32_0 = arith.constant 0 : i32
    %c0_i32_1 = arith.constant 0 : i32
    return %arg0, %c0_i32, %c0_i32_0 : i32, i32, i32
  }
  func.func @transform_1(%arg0: i32) -> (i32, i32) {
    %c0_i32 = arith.constant 0 : i32
    %c0_i32_0 = arith.constant 0 : i32
    %c0_i32_1 = arith.constant 0 : i32
    return %c0_i32, %c0_i32_0 : i32, i32
  }
  func.func @transform_2(%arg0: i32) -> (i32, i32) {
    %c0_i32 = arith.constant 0 : i32
    %c0_i32_0 = arith.constant 0 : i32
    %c0_i32_1 = arith.constant 0 : i32
    return %c0_i32, %c0_i32_0 : i32, i32
  }
  func.func @transform_3(%arg0: i32) -> (i32, i32) {
    %c0_i32 = arith.constant 0 : i32
    %c0_i32_0 = arith.constant 0 : i32
    %c0_i32_1 = arith.constant 0 : i32
    return %c0_i32, %c0_i32_0 : i32, i32
  }
  func.func @transform_4(%arg0: i32) -> (i32, i32) {
    %c0_i32 = arith.constant 0 : i32
    %c0_i32_0 = arith.constant 0 : i32
    %c0_i32_1 = arith.constant 0 : i32
    return %c0_i32, %c0_i32_0 : i32, i32
  }
  func.func @transform_5(%arg0: i32) -> (i32, i32, i32) {
    %c0_i32 = arith.constant 0 : i32
    %c0_i32_0 = arith.constant 0 : i32
    %c0_i32_1 = arith.constant 0 : i32
    return %arg0, %c0_i32, %c0_i32_0 : i32, i32, i32
  }
}

</mosaic_0001>

<bundles_post_ra>
// kernel: track_net_forward.1
= control target key start
LH: loop header
LB: loop body
LE: loop exit
PB: predicated region body
PF: predicated region fallthrough
CT: control target
= control target key end

     0   :  { %s863_s18 = smov 0   ;;  %s1002_s0 = inlined_call_operand.vmem [shape: f32[4,16,8], index: 0, kind: input, shape index: {}]   ;;  %s1003_s1 = inlined_call_operand.vmem [shape: bf16[136,64], index: 1, kind: input, shape index: {}]   ;;  %s1004_s2 = inlined_call_operand.vmem [shape: bf16[64,128], index: 2, kind: input, shape index: {}]   ;;  %s1005_s3 = inlined_call_operand.vmem [shape: f32[40,64], index: 3, kind: input, shape index: {}]   ;;  %s1006_s4 = inlined_call_operand.vmem [shape: f32[1,128], index: 4, kind: input, shape index: {}]   ;;  %s1007_s5 = inlined_call_operand.vmem [shape: f32[2,40,128], index: 5, kind: output, shape index: {}]  }
   0x1 LB: > { %s869_s19 = sadd.s32 4294967295, %s831_s18   ;;  %p709_p0 = scmp.ge.s32.totalorder %s831_s18, 1  ;;  %s831_s18 = sphi %s863_s18, %s15_s18  }
   0x2   : > { %p189_p1 = scmp.lt.s32.totalorder %s831_s18, 3 }
   0x4   : > { %p190_p2 = pnand %p709_p0, %p189_p1 }
   0x5   : > { %s710_s22 = sshll.u32 (!%p190_p2), %s869_s19, 1  ;;  %p225_p4 = scmp.lt.s32.totalorder (!%p190_p2), %s869_s19, 1 }
   0x6   : > { %193 = sbr.rel (%p190_p2) target bundleno = 640 (0x280), region = 40  ;;  %p219_p3 = scmp.lt.s32.totalorder (!%p190_p2), %s710_s22, 3 }
   0xb   : > { %v268_v0 = vld [vmem:[%s1003_s1 + $0x40] sm:$0xf]  ;;  %vm285_vm0 = vcmask 1043456   ;;  %s1009_s22 = smov (!%p219_p3, %s710_s22), 3  ;;  %vm235_vm1 = vcmask 64512   ;;  %v783_v8 = vld [vmem:[%s1003_s1 + $0x18] sm:$0xff] }
   0xc   : > { %v287_v1 = vsel %vm285_vm0, %v268_v0, 0  ;;  %s779_s23 = sshll.u32 %s1009_s22, 4  ;;  %350 = vmatpush.bf16.msra.mxu1 %v783_v8  ;;  %v782_v9 = vld [vmem:[%s1003_s1 + $0x10] sm:$0xff]  ;;  %v781_v10 = vld [vmem:[%s1003_s1 + $0x8] sm:$0xff]  ;;  %v780_v11 = vld [vmem:[%s1003_s1] sm:$0xff]  ;;  %vm339_vm2 = vcmask 523264  }
   0xd   : > { %296 = vmatpush.bf16.msra.mxu0 %v287_v1  ;;  %s223_s26 = scalar_lea.vmem %s1002_s0, %s779_s23  ;;  %v801_v16 = vld [vmem:[%s1005_s3] ss:$0 sm:$0xff]  ;;  %v787_v31 = vld [vmem:[%s1003_s1 + $0x38] sm:$0xff]  ;;  %v786_v32 = vld [vmem:[%s1003_s1 + $0x30] sm:$0xff]  ;;  %vm401_vm7 = vcmask 1041409   ;;  %vm404_vm8 = vcmask 1041408  }
   0xe   : > { %v231_v2 = vld [vmem:[%s223_s26] sm:$0xff]  ;;  %v232_v3 = vld [vmem:[%s223_s26 + $0x8] sm:$0xff]  ;;  %v233_v5 = vld [vmem:[%s223_s26 + $0x10] sm:$0xff]  ;;  %447 = vmatpush.bf16.msra.mxu2 %v787_v31  ;;  %s1011_s19 = smov (!%p225_p4, %s869_s19), 1 }
   0xf   : > { %v276_v4 = vpack.c.bf16 %v232_v3, %v231_v2  ;;  %v234_v6 = vld [vmem:[%s223_s26 + $0x18] sm:$0xff]  ;;  %v236_v12 = vsel %vm235_vm1, %v231_v2, 0.0  ;;  %v242_v13 = vsel %vm235_vm1, %v233_v5, 0.0  ;;  %v239_v15 = vsel %vm235_vm1, %v232_v3, 0.0  ;;  %v785_v33 = vld [vmem:[%s1003_s1 + $0x28] sm:$0xff]  ;;  %v784_v34 = vld [vmem:[%s1003_s1 + $0x20] sm:$0xff] }
  0x10   : > { %v277_v7 = vpack.c.bf16 %v234_v6, %v233_v5  ;;  %351 = vmatpush.bf16.msra.mxu1 %v782_v9  ;;  %237 = vadd.xlane.f32.xlu0 %v236_v12  ;;  %v245_v17 = vsel %vm235_vm1, %v234_v6, 0.0  ;;  %v802_v37 = vld [vmem:[%s1005_s3 + $0x1] ss:$0 sm:$0xff]  ;;  %v272_v39 = vld [vmem:[%s1005_s3 + $0x8] sm:$0xff]  ;;  %v273_v41 = vld [vmem:[%s1005_s3 + $0x10] sm:$0xff]  ;;  %s792_s21 = smul.u32 40, %s1011_s19 }
  0x11   : > { %714 = vmatmul.msk.bf16.vlgmr.msra.gmra.mxu0 %vm235_vm1, %v276_v4  ;;  %243 = vadd.xlane.f32.xlu1 %v242_v13  ;;  %v274_v55 = vld [vmem:[%s1005_s3 + $0x18] sm:$0xff]  ;;  %v275_v59 = vld [vmem:[%s1005_s3 + $0x20] sm:$0xff] }
  0x12   : > { %448 = vmatpush.bf16.msra.mxu2 %v786_v32  ;;  %s975_s19 = scalar_lea.vmem %s1007_s5, %s792_s21 }
  0x14   : > { %352 = vmatpush.bf16.msra.mxu1 %v781_v10 }
  0x16   : > { %449 = vmatpush.bf16.msra.mxu2 %v785_v33 }
  0x18   : > { %353 = vmatpush.bf16.msra.mxu1 %v780_v11  ;;  %240 = vadd.xlane.f32.xlu0 %v239_v15 }
  0x19   : > { %246 = vadd.xlane.f32.xlu1 %v245_v17 }
  0x1a   : > { %450 = vmatpush.bf16.msra.mxu2 %v784_v34 }
  0x21   : > { %715 = vmatmul.msk.bf16.gmra.mxu0 %vm235_vm1, %v277_v7 }
  0x83   : > { %v238_v35 = vpop.xlane.xlu0 %237 }
  0x84   : > { %vm248_vm3 = vcmp.eq.f32.partialorder %v238_v35, 0.0  ;;  %v244_v48 = vpop.xlane.xlu1 %243 }
  0x85   : > { %vm250_vm5 = vcmp.eq.f32.partialorder %v244_v48, 0.0 }
  0x8b   : > { %v241_v40 = vpop.xlane.xlu0 %240 }
  0x8c   : > { %vm249_vm4 = vcmp.eq.f32.partialorder %v241_v40, 0.0  ;;  %v247_v58 = vpop.xlane.xlu1 %246 }
  0x8d   : > { %vm251_vm6 = vcmp.eq.f32.partialorder %v247_v58, 0.0 }
  0x8e   : > { %v298_v14 = vpop.f32.mrf.mxu0 }
  0x8f   : > { %v299_v18 = vadd.f32 %v801_v16, %v298_v14 }
  0x91   : > { %v308_v21 = vmax.f32 %v299_v18, 0.0 }
  0x96   : > { %v300_v19 = vpop.f32.mrf.mxu0 }
  0x97   : > { %v301_v20 = vadd.f32 %v801_v16, %v300_v19  ;;  %v791_v19 = vld [vmem:[%s1004_s2 + $0x18] sm:$0xff] }
  0x98   : > { %523 = vmatpush.bf16.msra.mxu3 %v791_v19 }
  0x99   : > { %v309_v22 = vmax.f32 %v301_v20, 0.0  ;;  %v790_v20 = vld [vmem:[%s1004_s2 + $0x10] sm:$0xff] }
  0x9b   : > { %v312_v23 = vpack.c.bf16 %v309_v22, %v308_v21  ;;  %v789_v21 = vld [vmem:[%s1004_s2 + $0x8] sm:$0xff]  ;;  %v788_v22 = vld [vmem:[%s1004_s2] sm:$0xff] }
  0x9c   : > { %524 = vmatpush.bf16.msra.mxu3 %v790_v20 }
  0x9d   : > { %732 = vmatmul.msk.bf16.vlgmr.msra.gmra.mxu1 %vm339_vm2, %v312_v23 }
  0x9e   : > { %v303_v24 = vpop.f32.mrf.mxu0 }
  0x9f   : > { %v304_v25 = vadd.f32 %v801_v16, %v303_v24  ;;  %v803_v24 = vld [vmem:[%s1005_s3 + $0x2] ss:$0 sm:$0xff] }
  0xa0   : > { %525 = vmatpush.bf16.msra.mxu3 %v789_v21 }
  0xa1   : > { %v310_v28 = vmax.f32 %v304_v25, 0.0 }
  0xa4   : > { %526 = vmatpush.bf16.msra.mxu3 %v788_v22 }
  0xa6   : > { %v305_v26 = vpop.f32.mrf.mxu0 }
  0xa7   : > { %v306_v27 = vadd.f32 %v801_v16, %v305_v26 }
  0xa9   : > { %v311_v29 = vmax.f32 %v306_v27, 0.0 }
  0xab   : > { %v313_v30 = vpack.c.bf16 %v311_v29, %v310_v28 }
  0xad   : > { %733 = vmatmul.msk.bf16.gmra.mxu1 %vm339_vm2, %v313_v30 }
 0x11a   : > { %v355_v36 = vpop.f32.mrf.mxu1 }
 0x11b   : > { %v356_v38 = vadd.f32 %v802_v37, %v355_v36 }
 0x11d   : > { %v365_v43 = vadd.f32 %v356_v38, %v272_v39 }
 0x11f   : > { %v377_v46 = vsel %vm248_vm3, 0.0, %v365_v43  ;;  %v804_v43 = vld [vmem:[%s1006_s4] ss:$0 sm:$0xff] }
 0x120   : > { %v381_v52 = vsel %vm339_vm2, %v377_v46, -inf }
 0x122   : > { %v357_v42 = vpop.f32.mrf.mxu1 }
 0x123   : > { %v358_v44 = vadd.f32 %v802_v37, %v357_v42 }
 0x125   : > { %v366_v45 = vadd.f32 %v358_v44, %v273_v41 }
 0x127   : > { %v378_v47 = vsel %vm249_vm4, 0.0, %v366_v45 }
 0x128   : > { %v406_v49 = vpack.c.bf16 %v378_v47, %v377_v46  ;;  %v382_v50 = vsel %vm339_vm2, %v378_v47, -inf }
 0x129   : > { %v383_v53 = vmax.f32 %v381_v52, %v382_v50 }
 0x12a   : > { %v360_v51 = vpop.f32.mrf.mxu1  ;;  %750 = vmatmul.msk.bf16.vlgmr.msra.gmra.mxu2 %vm339_vm2, %v406_v49 }
 0x12b   : > { %v361_v54 = vadd.f32 %v802_v37, %v360_v51  ;;  %v384_v56 = vrot.slane %v383_v53, 4 }
 0x12d   : > { %v367_v57 = vadd.f32 %v361_v54, %v274_v55  ;;  %v385_v62 = vmax.f32 %v383_v53, %v384_v56 }
 0x12f   : > { %v379_v63 = vsel %vm250_vm5, 0.0, %v367_v57  ;;  %v386_v5 = vrot.slane %v385_v62, 2  ;;  %v542_v57 = vlaneseq }
 0x130   : > { %v390_v2 = vsel %vm339_vm2, %v379_v63, -inf }
 0x131   : > { %v387_v8 = vmax.f32 %v385_v62, %v386_v5 }
 0x132   : > { %v362_v60 = vpop.f32.mrf.mxu1 }
 0x133   : > { %v363_v61 = vadd.f32 %v802_v37, %v362_v60  ;;  %v388_v11 = vrot.slane %v387_v8, 1 }
 0x135   : > { %v368_v0 = vadd.f32 %v363_v61, %v275_v59  ;;  %v389_v14 = vmax.f32 %v387_v8, %v388_v11  ;;  %v966_v61 = vand.u32 127, %v542_v57 }
 0x137   : > { %v380_v1 = vsel %vm251_vm6, 0.0, %v368_v0  ;;  %vm544_vm11 = vcmp.eq.s32.totalorder %v966_v61, 7 }
 0x138   : > { %v391_v3 = vsel %vm339_vm2, %v380_v1, -inf  ;;  %v407_v4 = vpack.c.bf16 %v380_v1, %v379_v63 }
 0x139   : > { %v392_v6 = vmax.f32 %v390_v2, %v391_v3 }
 0x13a   : > { %751 = vmatmul.msk.bf16.gmra.mxu2 %vm339_vm2, %v407_v4 }
 0x13b   : > { %v393_v7 = vrot.slane %v392_v6, 4 }
 0x13d   : > { %v394_v9 = vmax.f32 %v392_v6, %v393_v7 }
 0x13f   : > { %v395_v10 = vrot.slane %v394_v9, 2 }
 0x141   : > { %v396_v12 = vmax.f32 %v394_v9, %v395_v10 }
 0x143   : > { %v397_v13 = vrot.slane %v396_v12, 1 }
 0x145   : > { %v398_v15 = vmax.f32 %v396_v12, %v397_v13 }
 0x147   : > { %v402_v16 = vsel %vm401_vm7, %v398_v15, %v389_v14 }
 0x148   : > { %v405_v17 = vsel %vm404_vm8, %v402_v16, 0.0 }
 0x149   : > { %v408_v18 = vpack.c.bf16 %v405_v17, %v405_v17 }
 0x14b   : > { %752 = vmatmul.msk.bf16.gmra.mxu2 %vm339_vm2, %v408_v18 }
 0x1ad   : > { %v452_v23 = vpop.f32.mrf.mxu2 }
 0x1ae   : > { %v453_v25 = vadd.f32 %v803_v24, %v452_v23 }
 0x1b0   : > { %v466_v28 = vmax.f32 %v453_v25, 0.0 }
 0x1b5   : > { %v454_v26 = vpop.f32.mrf.mxu2 }
 0x1b6   : > { %v455_v27 = vadd.f32 %v803_v24, %v454_v26 }
 0x1b8   : > { %v467_v29 = vmax.f32 %v455_v27, 0.0 }
 0x1ba   : > { %v471_v30 = vpack.c.bf16 %v467_v29, %v466_v28 }
 0x1bc   : > { %769 = vmatmul.msk.bf16.vlgmr.msra.gmra.mxu3 %vm339_vm2, %v471_v30 }
 0x1bd   : > { %v457_v31 = vpop.f32.mrf.mxu2 }
 0x1be   : > { %v458_v32 = vadd.f32 %v803_v24, %v457_v31 }
 0x1c0   : > { %v468_v35 = vmax.f32 %v458_v32, 0.0 }
 0x1c5   : > { %v459_v33 = vpop.f32.mrf.mxu2 }
 0x1c6   : > { %v460_v34 = vadd.f32 %v803_v24, %v459_v33 }
 0x1c8   : > { %v469_v36 = vmax.f32 %v460_v34, 0.0 }
 0x1ca   : > { %v472_v37 = vpack.c.bf16 %v469_v36, %v468_v35 }
 0x1cc   : > { %770 = vmatmul.msk.bf16.gmra.mxu3 %vm339_vm2, %v472_v37 }
 0x1ce   : > { %v462_v38 = vpop.f32.mrf.mxu2 }
 0x1cf   : > { %v463_v39 = vadd.f32 %v803_v24, %v462_v38 }
 0x1d1   : > { %v470_v40 = vmax.f32 %v463_v39, 0.0 }
 0x1d3   : > { %v473_v42 = vpack.c.bf16 %v470_v40, %v470_v40 }
 0x1d6   : > { %v464_v41 = vpop.f32.mrf.mxu2 }
 0x1dc   : > { %771 = vmatmul.msk.bf16.gmra.mxu3 %vm339_vm2, %v473_v42 }
 0x23f   : > { %v528_v44 = vpop.f32.mrf.mxu3 }
 0x240   : > { %v529_v45 = vadd.f32 %v804_v43, %v528_v44 }
 0x242   : > { %v772_v46 = vmul.f32 -1.442695, %v529_v45 }
 0x244   : > { %805 = vpow2.f32 %v772_v46 }
 0x247   : > { %v530_v47 = vpop.f32.mrf.mxu3 }
 0x248   : > { %v958_v48 = vadd.f32 %v804_v43, %v530_v47 }
 0x24a   : > { %v806_v49 = vpop.eup %805  ;;  %v773_v50 = vmul.f32 -1.442695, %v958_v48 }
 0x24b   : > { %v560_v51 = vadd.f32 1.0, %v806_v49 }
 0x24c   : > { %807 = vpow2.f32 %v773_v50 }
 0x24d   : > { %809 = vrcp.f32 %v560_v51  ;;  %v576_v62 = vand.u32 2147483648, %v560_v51  ;;  %v574_v1 = vand.u32 2147483647, %v560_v51  ;;  %vm570_vm10 = vweird.f32 %v560_v51 }
 0x24f   : > { %v533_v52 = vpop.f32.mrf.mxu3  ;;  %v577_v7 = vor.u32 1.1754944e-38, %v576_v62  ;;  %vm575_vm13 = vcmp.eq.f32.partialorder %v574_v1, 8.507059e+37 }
 0x250   : > { %v962_v53 = vadd.f32 %v804_v43, %v533_v52 }
 0x252   : > { %v808_v54 = vpop.eup %807  ;;  %v774_v55 = vmul.f32 -1.442695, %v962_v53 }
 0x253   : > { %v810_v56 = vpop.eup %809  ;;  %v561_v58 = vadd.f32 1.0, %v808_v54 }
 0x254   : > { %v566_v59 = vmul.f32 %v810_v56, %v560_v51  ;;  %811 = vpow2.f32 %v774_v55  ;;  %vm571_vm9 = vweird.f32 %v810_v56 }
 0x255   : > { %813 = vrcp.f32 %v561_v58  ;;  %vm572_vm12 = vmor %vm570_vm10, %vm571_vm9  ;;  %v591_v14 = vand.u32 2147483648, %v561_v58  ;;  %v589_v17 = vand.u32 2147483647, %v561_v58  ;;  %vm585_vm15 = vweird.f32 %v561_v58 }
 0x256   : > { %v567_v60 = vsub.f32 1.0, %v566_v59 }
 0x257   : > { %v535_v63 = vpop.f32.mrf.mxu3  ;;  %v592_v23 = vor.u32 1.1754944e-38, %v591_v14  ;;  %vm590_vm1 = vcmp.eq.f32.partialorder %v589_v17, 8.507059e+37 }
 0x258   : > { %v568_v0 = vmul.f32 %v810_v56, %v567_v60  ;;  %v968_v2 = vadd.f32 %v804_v43, %v535_v63 }
 0x25a   : > { %v812_v3 = vpop.eup %811  ;;  %v569_v4 = vadd.f32 %v810_v56, %v568_v0  ;;  %v775_v5 = vmul.f32 -1.442695, %v968_v2 }
 0x25b   : > { %v814_v6 = vpop.eup %813  ;;  %v562_v8 = vadd.f32 1.0, %v812_v3 }
 0x25c   : > { %v573_v9 = vsel %vm572_vm12, %v810_v56, %v569_v4  ;;  %v581_v10 = vmul.f32 %v814_v6, %v561_v58  ;;  %815 = vpow2.f32 %v775_v5  ;;  %vm586_vm14 = vweird.f32 %v814_v6 }
 0x25d   : > { %v578_v11 = vsel %vm575_vm13, %v577_v7, %v573_v9  ;;  %817 = vrcp.f32 %v562_v8  ;;  %vm587_vm0 = vmor %vm585_vm15, %vm586_vm14  ;;  %v606_v30 = vand.u32 2147483648, %v562_v8  ;;  %v604_v33 = vand.u32 2147483647, %v562_v8 }
 0x25e   : > { %v640_v12 = vsel %vm544_vm11, %v578_v11, %v529_v45  ;;  %v582_v13 = vsub.f32 1.0, %v581_v10  ;;  %vm600_vm3 = vweird.f32 %v562_v8 }
 0x25f   : > { %645 = vst [vmem:[%s975_s19] sm:$0xff] %v640_v12  ;;  %v538_v15 = vpop.f32.mrf.mxu3  ;;  %v607_v37 = vor.u32 1.1754944e-38, %v606_v30  ;;  %vm605_vm5 = vcmp.eq.f32.partialorder %v604_v33, 8.507059e+37 }
 0x260   : > { %v583_v16 = vmul.f32 %v814_v6, %v582_v13  ;;  %v980_v18 = vadd.f32 %v804_v43, %v538_v15 }
 0x262   : > { %v816_v19 = vpop.eup %815  ;;  %v584_v20 = vadd.f32 %v814_v6, %v583_v16  ;;  %v776_v21 = vmul.f32 -1.442695, %v980_v18 }
 0x263   : > { %v818_v22 = vpop.eup %817  ;;  %v563_v24 = vadd.f32 1.0, %v816_v19 }
 0x264   : > { %v588_v25 = vsel %vm587_vm0, %v814_v6, %v584_v20  ;;  %v596_v26 = vmul.f32 %v818_v22, %v562_v8  ;;  %819 = vpow2.f32 %v776_v21  ;;  %vm601_vm2 = vweird.f32 %v818_v22 }
 0x265   : > { %v593_v27 = vsel %vm590_vm1, %v592_v23, %v588_v25  ;;  %821 = vrcp.f32 %v563_v24  ;;  %vm602_vm4 = vmor %vm600_vm3, %vm601_vm2  ;;  %v621_v44 = vand.u32 2147483648, %v563_v24  ;;  %v619_v46 = vand.u32 2147483647, %v563_v24 }
 0x266   : > { %v641_v28 = vsel %vm544_vm11, %v593_v27, %v958_v48  ;;  %v597_v29 = vsub.f32 1.0, %v596_v26  ;;  %vm615_vm7 = vweird.f32 %v563_v24 }
 0x267   : > { %646 = vst [vmem:[%s975_s19 + $0x8] sm:$0xff] %v641_v28  ;;  %v540_v31 = vpop.f32.mrf.mxu3  ;;  %v622_v49 = vor.u32 1.1754944e-38, %v621_v44  ;;  %vm620_vm9 = vcmp.eq.f32.partialorder %v619_v46, 8.507059e+37 }
 0x268   : > { %v598_v32 = vmul.f32 %v818_v22, %v597_v29 }
 0x26a   : > { %v820_v34 = vpop.eup %819  ;;  %v599_v35 = vadd.f32 %v818_v22, %v598_v32 }
 0x26b   : > { %v822_v36 = vpop.eup %821  ;;  %v564_v38 = vadd.f32 1.0, %v820_v34 }
 0x26c   : > { %v603_v39 = vsel %vm602_vm4, %v818_v22, %v599_v35  ;;  %v611_v40 = vmul.f32 %v822_v36, %v563_v24  ;;  %vm616_vm6 = vweird.f32 %v822_v36 }
 0x26d   : > { %v608_v41 = vsel %vm605_vm5, %v607_v37, %v603_v39  ;;  %823 = vrcp.f32 %v564_v38  ;;  %vm617_vm8 = vmor %vm615_vm7, %vm616_vm6  ;;  %v636_v55 = vand.u32 2147483648, %v564_v38  ;;  %v634_v57 = vand.u32 2147483647, %v564_v38 }
 0x26e   : > { %v642_v42 = vsel %vm544_vm11, %v608_v41, %v962_v53  ;;  %v612_v43 = vsub.f32 1.0, %v611_v40  ;;  %vm630_vm12 = vweird.f32 %v564_v38 }
 0x26f   : > { %647 = vst [vmem:[%s975_s19 + $0x10] sm:$0xff] %v642_v42  ;;  %v637_v59 = vor.u32 1.1754944e-38, %v636_v55  ;;  %vm635_vm14 = vcmp.eq.f32.partialorder %v634_v57, 8.507059e+37 }
 0x270   : > { %v613_v45 = vmul.f32 %v822_v36, %v612_v43 }
 0x272   : > { %v614_v47 = vadd.f32 %v822_v36, %v613_v45 }
 0x273   : > { %v824_v48 = vpop.eup %823 }
 0x274   : > { %v618_v50 = vsel %vm617_vm8, %v822_v36, %v614_v47  ;;  %v626_v51 = vmul.f32 %v824_v48, %v564_v38  ;;  %vm631_vm10 = vweird.f32 %v824_v48 }
 0x275   : > { %v623_v52 = vsel %vm620_vm9, %v622_v49, %v618_v50  ;;  %vm632_vm13 = vmor %vm630_vm12, %vm631_vm10 }
 0x276   : > { %v643_v53 = vsel %vm544_vm11, %v623_v52, %v968_v2  ;;  %v627_v54 = vsub.f32 1.0, %v626_v51 }
 0x277   : > { %648 = vst [vmem:[%s975_s19 + $0x18] sm:$0xff] %v643_v53 }
 0x278   : > { %v628_v56 = vmul.f32 %v824_v48, %v627_v54 }
 0x27a   : > { %v629_v58 = vadd.f32 %v824_v48, %v628_v56 }
 0x27c   : > { %v633_v60 = vsel %vm632_vm13, %v824_v48, %v629_v58 }
 0x27d   : > { %v638_v62 = vsel %vm635_vm14, %v637_v59, %v633_v60 }
 0x27e   : > { %v644_v63 = vsel %vm544_vm11, %v638_v62, %v980_v18 }
 0x27f   : > { %649 = vst [vmem:[%s975_s19 + $0x20] sm:$0xff] %v644_v63 }
 0x280 PF: > { %s15_s18 = sadd.s32 1, %s831_s18  }
 0x281   : > { %p12_p5 = scmp.ge.s32.totalorder %s15_s18, 4  }
 0x283   :  { %14 = sbr.rel (!%p12_p5) target bundleno = 1 (0x1), region = 70 }

</bundles_post_ra>
